<compile_context>
chip_gen: v7x
topology: tpu7x:2x2x1
jax: 0.10.0
libtpu: 0.0.40
codegen_flags: <defaults>
</compile_context>

<pallas_src>
import functools

import jax
import jax.numpy as jnp
from jax import lax
from jax.experimental import pallas as pl
from jax.experimental.pallas import tpu as pltpu

NORMALIZATION_FACTOR = 1.0 / 9.48933


def _round_up(x, m):
    return (x + m - 1) // m * m


def _cdiv(a, b):
    return -(-a // b)


def _quadrupole_kernel(shift_ref, packed_ref, o_ref, *, g_pad):
    """Accumulate flattened per-graph quadrupoles over one node tile.

    shift_ref  : (1, 1) f32 SMEM scalar (global charge mean, 0 if disabled)
    packed_ref : (5, T) f32 VMEM block; rows = [x, y, z, q, batch_id_as_f32]
    o_ref      : (1, g_pad, 6) f32 accumulator block resident across the inner
                 grid axis; columns = [xx, xy, xz, yy, yz, zz].
    """
    t = pl.program_id(1)

    @pl.when(t == 0)
    def _init():
        o_ref[...] = jnp.zeros_like(o_ref)

    tile = packed_ref.shape[1]

    x = packed_ref[pl.ds(0, 1), :]                         # (1, T)
    y = packed_ref[pl.ds(1, 1), :]
    z = packed_ref[pl.ds(2, 1), :]
    q = packed_ref[pl.ds(3, 1), :] - shift_ref[0, 0]       # (1, T)
    b = packed_ref[pl.ds(4, 1), :].astype(jnp.int32)       # (1, T), pad = -1

    # Symmetric pair products of the coordinates: (6, T).
    p = jnp.concatenate([x * x, x * y, x * z, y * y, y * z, z * z], axis=0)

    # One-hot weighted charges for all graphs at once: (g_pad, T).
    gids = lax.broadcasted_iota(jnp.int32, (g_pad, tile), 0)
    w = jnp.where(b == gids, q, 0.0)

    # Single MXU contraction over the node (lane) axis: (g_pad, 6).
    acc = lax.dot_general(w, p, (((1,), (1,)), ((), ())),
                          preferred_element_type=jnp.float32)
    o_ref[0, :, :] += acc


def quadrupole_forward(positions, q, batch=None, num_graphs=None,
                       remove_mean=True,
                       normalization_factor=NORMALIZATION_FACTOR,
                       tile_n=65536, num_partials=1,
                       split_core_parallel=False):
    """Pallas implementation of Quadrupole.forward.

    positions: (N, 3) float; q: (N,) or (N, 1) float; batch: (N,) int or None.
    Returns (num_graphs, 3, 3) float32  (== data['pred_quadrupole']).
    """
    n, d = positions.shape
    assert d == 3, "r dimension error"
    q = jnp.reshape(q, (-1,)).astype(jnp.float32)
    assert q.shape[0] == n, "q dimension error"

    if batch is None:
        batch = jnp.zeros((n,), dtype=jnp.int32)
        num_graphs = 1
    if num_graphs is None:
        raise ValueError("num_graphs must be given statically when batch is not None")
    num_graphs = int(num_graphs)
    assert num_graphs < (1 << 24), "graph ids must be exactly representable in f32"
    g_pad = _round_up(num_graphs, 8)

    # Global mean over the ORIGINAL (unpadded) charges, computed once.
    if remove_mean:
        shift = jnp.mean(q).reshape(1, 1).astype(jnp.float32)
    else:
        shift = jnp.zeros((1, 1), dtype=jnp.float32)

    # Lane-dense per-node streams (node axis last).
    r_t = positions.astype(jnp.float32).T          # (3, N)
    q_row = q[None, :]                             # (1, N)
    b_row = batch.astype(jnp.float32)[None, :]     # (1, N)

    # Tile sizing: derive from cdiv(n, n_splits) so the split never adds a
    # full extra tile of padded nodes; tiles are multiples of 128 lanes.
    n_splits = max(1, min(int(num_partials), _cdiv(n, 128)))
    per_split = _cdiv(n, n_splits)
    tile = _round_up(min(int(tile_n), _round_up(per_split, 128)), 128)
    tps = _cdiv(per_split, tile)                   # tiles per split
    n_pad_total = n_splits * tps * tile
    pad = n_pad_total - n
    if pad:
        r_t = jnp.pad(r_t, ((0, 0), (0, pad)))
        q_row = jnp.pad(q_row, ((0, 0), (0, pad)))
        # Padded nodes get batch id -1 -> never match any graph.
        b_row = jnp.pad(b_row, ((0, 0), (0, pad)), constant_values=-1.0)

    # One packed (5, N_pad) stream: rows x, y, z, q, batch.
    packed = jnp.concatenate([r_t, q_row, b_row], axis=0)

    kernel = functools.partial(_quadrupole_kernel, g_pad=g_pad)

    split_sem = pltpu.CORE_PARALLEL if split_core_parallel else "parallel"

    partials = pl.pallas_call(
        kernel,
        out_shape=jax.ShapeDtypeStruct((n_splits, g_pad, 6), jnp.float32),
        grid=(n_splits, tps),
        in_specs=[
            pl.BlockSpec(memory_space=pltpu.MemorySpace.SMEM),        # mean shift
            pl.BlockSpec((5, tile), lambda s, t: (0, s * tps + t)),   # packed stream
        ],
        out_specs=pl.BlockSpec((1, g_pad, 6), lambda s, t: (s, 0, 0)),
        compiler_params=pltpu.CompilerParams(
            dimension_semantics=(split_sem, "arbitrary"),
            vmem_limit_bytes=32 * 1024 * 1024,
        ),
    )(shift, packed)

    # Tiny O(G) epilogue in XLA: sum split partials, unflatten the symmetric
    # 6-vector to (3,3), traceless projection, normalization.
    if n_splits > 1:
        flat = jnp.sum(partials, axis=0)[:num_graphs]        # (G, 6)
    else:
        flat = partials[0, :num_graphs]
    sym_idx = jnp.array([0, 1, 2, 1, 3, 4, 2, 4, 5], dtype=jnp.int32)
    quad = jnp.take(flat, sym_idx, axis=1).reshape(num_graphs, 3, 3)
    tr = flat[:, 0] + flat[:, 3] + flat[:, 5]
    eye = jnp.eye(3, dtype=jnp.float32)
    quad = quad - (tr * (1.0 / 3.0))[:, None, None] * eye
    return quad * jnp.float32(normalization_factor)


def _reference(positions, q, batch, num_graphs, remove_mean=True,
               normalization_factor=NORMALIZATION_FACTOR):
    if q.ndim == 1:
        q = q[:, None]
    if remove_mean:
        q = q - jnp.mean(q, axis=0, keepdims=True)
    eye = jnp.eye(3, dtype=jnp.float32)
    results = []
    for i in range(num_graphs):
        m = batch == i
        r_now = positions[m]
        q_now = q[m]
        rij = r_now[:, :, None] * r_now[:, None, :]
        quad = jnp.sum(q_now.reshape(-1, 1, 1) * rij, axis=0)
        quad = quad - (1.0 / 3.0) * jnp.trace(quad) * eye
        results.append(quad * normalization_factor)
    return jnp.stack(results, axis=0)


if __name__ == "__main__":
    key = jax.random.PRNGKey(0)
    k_r, k_q, k_r2, k_q2, k_b2 = jax.random.split(key, 5)

    # --- Test 1: small uneven graphs, single tile / single split ---
    num_graphs = 2
    n = 16
    positions = jax.random.normal(k_r, (n, 3), dtype=jnp.float32)
    charges = jax.random.normal(k_q, (n,), dtype=jnp.float32)
    batch = jnp.concatenate(
        [jnp.zeros((7,), jnp.int32), jnp.ones((9,), jnp.int32)])

    out = quadrupole_forward(positions, charges, batch, num_graphs=num_graphs)
    out = jax.block_until_ready(out)
    ref = _reference(positions, charges, batch, num_graphs)
    assert out.shape == (num_graphs, 3, 3)
    assert jnp.allclose(out, ref, atol=1e-5, rtol=1e-5), (out, ref)

    # --- Test 2: multiple node tiles + 2 splits + padding ---
    num_graphs2 = 3
    n2 = 300
    positions2 = jax.random.normal(k_r2, (n2, 3), dtype=jnp.float32)
    charges2 = jax.random.normal(k_q2, (n2,), dtype=jnp.float32)
    batch2 = jax.random.randint(k_b2, (n2,), 0, num_graphs2, dtype=jnp.int32)

    out2 = quadrupole_forward(positions2, charges2, batch2, num_graphs=num_graphs2,
                              tile_n=128, num_partials=2)
    out2 = jax.block_until_ready(out2)
    ref2 = _reference(positions2, charges2, batch2, num_graphs2)
    assert out2.shape == (num_graphs2, 3, 3)
    assert jnp.allclose(out2, ref2, atol=1e-4, rtol=1e-4), (out2, ref2)

    # --- Test 2b: multi-tile accumulation on a single split (default path) ---
    out2b = quadrupole_forward(positions2, charges2, batch2, num_graphs=num_graphs2,
                               tile_n=128, num_partials=1)
    out2b = jax.block_until_ready(out2b)
    assert jnp.allclose(out2b, ref2, atol=1e-4, rtol=1e-4), (out2b, ref2)

    # --- Test 3: remove_mean=False path ---
    out3 = quadrupole_forward(positions, charges, batch, num_graphs=num_graphs,
                              remove_mean=False)
    out3 = jax.block_until_ready(out3)
    ref3 = _reference(positions, charges, batch, num_graphs, remove_mean=False)
    assert jnp.allclose(out3, ref3, atol=1e-5, rtol=1e-5), (out3, ref3)

    print("KERNEL_OK")
</pallas_src>

<mosaic_0001>
module attributes {stable_mosaic.version = 11 : i64} {
  func.func @_quadrupole_kernel(%arg0: i32, %arg1: i32, %arg2: memref<1x1xf32, #tpu.memory_space<smem>>, %arg3: memref<5x128xf32, #tpu.memory_space<vmem>>, %arg4: memref<1x8x6xf32, #tpu.memory_space<vmem>>) attributes {dimension_semantics = [#tpu.dimension_semantics<parallel>, #tpu.dimension_semantics<arbitrary>], iteration_bounds = array<i64: 1, 1>, scalar_prefetch = 0 : i64, scratch_operands = 0 : i64, tpu.core_type = #tpu.core_type<tc>, window_params = [{transform_indices = @transform_0, window_bounds = array<i64: 1, 1>}, {transform_indices = @transform_1, window_bounds = array<i64: 5, 128>}, {transform_indices = @transform_2, window_bounds = array<i64: 1, 8, 6>}]} {
    %c0_i32 = arith.constant 0 : i32
    %0 = arith.cmpi eq, %arg1, %c0_i32 : i32
    %1 = arith.extui %0 : i1 to i32
    %c0_i32_0 = arith.constant 0 : i32
    %2 = arith.cmpi ne, %1, %c0_i32_0 : i32
    scf.if %2 {
      %cst_15 = arith.constant 0.000000e+00 : f32
      %33 = vector.broadcast %cst_15 : f32 to vector<1x8x6xf32>
      %c0_16 = arith.constant 0 : index
      %c0_17 = arith.constant 0 : index
      %c0_18 = arith.constant 0 : index
      %34 = vector.load %arg4[%c0_16, %c0_17, %c0_18] : memref<1x8x6xf32, #tpu.memory_space<vmem>>, vector<1x8x6xf32>
      tpu.vector_store %arg4[%c0_16, %c0_17, %c0_18], %33 {strides = array<i32>} : memref<1x8x6xf32, #tpu.memory_space<vmem>>, vector<1x8x6xf32>,
    } else {
    }
    %c0 = arith.constant 0 : index
    %c0_1 = arith.constant 0 : index
    %3 = vector.load %arg3[%c0, %c0_1] : memref<5x128xf32, #tpu.memory_space<vmem>>, vector<1x128xf32>
    %c1 = arith.constant 1 : index
    %c0_2 = arith.constant 0 : index
    %4 = vector.load %arg3[%c1, %c0_2] : memref<5x128xf32, #tpu.memory_space<vmem>>, vector<1x128xf32>
    %c2 = arith.constant 2 : index
    %c0_3 = arith.constant 0 : index
    %5 = vector.load %arg3[%c2, %c0_3] : memref<5x128xf32, #tpu.memory_space<vmem>>, vector<1x128xf32>
    %c3 = arith.constant 3 : index
    %c0_4 = arith.constant 0 : index
    %6 = vector.load %arg3[%c3, %c0_4] : memref<5x128xf32, #tpu.memory_space<vmem>>, vector<1x128xf32>
    %c0_5 = arith.constant 0 : index
    %c0_6 = arith.constant 0 : index
    %7 = memref.load %arg2[%c0_5, %c0_6] : memref<1x1xf32, #tpu.memory_space<smem>>
    %8 = vector.broadcast %7 : f32 to vector<1x128xf32>
    %9 = arith.subf %6, %8 : vector<1x128xf32>
    %c4 = arith.constant 4 : index
    %c0_7 = arith.constant 0 : index
    %10 = vector.load %arg3[%c4, %c0_7] : memref<5x128xf32, #tpu.memory_space<vmem>>, vector<1x128xf32>
    %11 = arith.fptosi %10 : vector<1x128xf32> to vector<1x128xi32>
    %12 = arith.mulf %3, %3 : vector<1x128xf32>
    %13 = arith.mulf %3, %4 : vector<1x128xf32>
    %14 = arith.mulf %3, %5 : vector<1x128xf32>
    %15 = arith.mulf %4, %4 : vector<1x128xf32>
    %16 = arith.mulf %4, %5 : vector<1x128xf32>
    %17 = arith.mulf %5, %5 : vector<1x128xf32>
    %18 = tpu.concatenate %12, %13, %14, %15, %16, %17 in 0 : vector<1x128xf32>, vector<1x128xf32>, vector<1x128xf32>, vector<1x128xf32>, vector<1x128xf32>, vector<1x128xf32> -> vector<6x128xf32>
    %19 = tpu.iota {dimensions = array<i32: 0>} : vector<8x128xi32>
    %20 = vector.broadcast %11 : vector<1x128xi32> to vector<8x128xi32>
    %21 = arith.cmpi eq, %20, %19 : vector<8x128xi32>
    %cst = arith.constant 0.000000e+00 : f32
    %22 = vector.shape_cast %9 : vector<1x128xf32> to vector<1x128xf32>
    %23 = vector.broadcast %22 : vector<1x128xf32> to vector<8x128xf32>
    %24 = vector.broadcast %cst : f32 to vector<8x128xf32>
    %25 = arith.select %21, %23, %24 : vector<8x128xi1>, vector<8x128xf32>
    %cst_8 = arith.constant dense<0.000000e+00> : vector<8x6xf32>
    %26 = tpu.matmul %25, %18, %cst_8 {dimension_numbers = #tpu.dot_dimension_numbers<[1], [1], [0], [0], [0, 0, 1, 0], [], []>} : vector<8x128xf32>, vector<6x128xf32>, vector<8x6xf32> -> vector<8x6xf32>
    %c0_9 = arith.constant 0 : index
    %c0_10 = arith.constant 0 : index
    %c0_11 = arith.constant 0 : index
    %27 = vector.load %arg4[%c0_9, %c0_10, %c0_11] : memref<1x8x6xf32, #tpu.memory_space<vmem>>, vector<1x8x6xf32>
    %28 = vector.shape_cast %27 : vector<1x8x6xf32> to vector<8x6xf32>
    %29 = arith.addf %28, %26 : vector<8x6xf32>
    %c0_12 = arith.constant 0 : index
    %c0_13 = arith.constant 0 : index
    %c0_14 = arith.constant 0 : index
    %30 = vector.load %arg4[%c0_12, %c0_13, %c0_14] : memref<1x8x6xf32, #tpu.memory_space<vmem>>, vector<1x8x6xf32>
    %31 = vector.shape_cast %30 : vector<1x8x6xf32> to vector<8x6xf32>
    %32 = vector.shape_cast %29 : vector<8x6xf32> to vector<1x8x6xf32>
    tpu.vector_store %arg4[%c0_12, %c0_13, %c0_14], %32 {strides = array<i32>} : memref<1x8x6xf32, #tpu.memory_space<vmem>>, vector<1x8x6xf32>,
    return
  }
  func.func @transform_0(%arg0: i32, %arg1: i32) -> (i32, i32) {
    %c0_i32 = arith.constant 0 : i32
    %c0_i32_0 = arith.constant 0 : i32
    %c0_i32_1 = arith.constant 0 : i32
    return %c0_i32, %c0_i32_0 : i32, i32
  }
  func.func @transform_1(%arg0: i32, %arg1: i32) -> (i32, i32) {
    %c1_i32 = arith.constant 1 : i32
    %0 = arith.muli %arg0, %c1_i32 : i32
    %1 = arith.addi %0, %arg1 : i32
    %c0_i32 = arith.constant 0 : i32
    %c0_i32_0 = arith.constant 0 : i32
    return %c0_i32, %1 : i32, i32
  }
  func.func @transform_2(%arg0: i32, %arg1: i32) -> (i32, i32, i32) {
    %c0_i32 = arith.constant 0 : i32
    %c0_i32_0 = arith.constant 0 : i32
    %c0_i32_1 = arith.constant 0 : i32
    return %arg0, %c0_i32, %c0_i32_0 : i32, i32, i32
  }
}

</mosaic_0001>

<bundles_post_ra>
// kernel: tpu_custom_call.1
= control target key start
LH: loop header
LB: loop body
LE: loop exit
PB: predicated region body
PF: predicated region fallthrough
CT: control target
= control target key end

     0   :  { %8 = vsyncpa [#allocation4], 0  ;;  %s202_s9 = smov [#allocation3]   ;;  %s247_s0 = inlined_call_operand.<no memory space> [shape: f32[1,1], index: 0, kind: input, shape index: {}]   ;;  %s248_s1 = inlined_call_operand.hbm [shape: f32[5,128], index: 1, kind: input, shape index: {}]   ;;  %s249_s2 = inlined_call_operand.vmem [shape: f32[1,8,6], index: 2, kind: output, shape index: {}]  }
   0x1   :  { %s20_s10 = sshll.u32 %s202_s9, 4  ;;  %s178_s13 = scalar_lea.hbm %s248_s1, 128  ;;  %s21_s10 = int_to_ptr.vmem [resolvable:$true] %s20_s10 }
   0x2   :  { %p179_p0 = scmp.ne.s32.totalorder %s248_s1, %s178_s13  ;;  %p182_p1 = scmp.lt.u32.totalorder %s178_s13, %s248_s1 }
   0x4   :  { %p184_p2 = pnand %p182_p1, %p179_p0 }
   0x6   :  { %187 = shalt.err (!%p184_p2)
}
   0x7   :  { %s188_s18 = scalar_lea.vmem %s21_s10, 128  ;;  %p193_p4 = scmp.lt.s32.totalorder %s21_s10, %s21_s10 }
   0x8   :  { %p189_p3 = scmp.ne.s32.totalorder %s21_s10, %s188_s18  ;;  %p194_p5 = scmp.lt.s32.totalorder %s188_s18, %s188_s18 }
   0xa   :  { %p195_p6 = por %p194_p5, %p193_p4 }
   0xc   :  { %p196_p7 = pnand %p195_p6, %p189_p3 }
   0xe   :  { %199 = shalt.err (!%p196_p7)
}
   0xf   :  { %23 = dma.hbm_to_vmem [thread:$0]  %s248_s1, 128, %s21_s10, [#allocation4]  }
  0x10   :  { %200 = dma.done.wait [#allocation4], 128  }
  0x11   :  { %201 = vsyncadd [#allocation4], 4294967168  ;;  %vm32_vm0 = vcmask 48128   ;;  %v203_v0 = vmov 0.0   ;;  %vm204_vm1 = vmmov 0   ;;  %v74_v1 = vlaneseq }
  0x12   :  { %33 = vst.msk [vmem:[%s249_s2] sm:$0xff] %vm32_vm0, %v203_v0  ;;  %168 = vmatprep.subr.mxu0 %v203_v0  ;;  %170 = vmatprep.mubr.msk.f32.mxu0 %vm204_vm1, %v203_v0  ;;  %vm64_vm2 = vcmask 1040384   ;;  %v34_v3 = vld [vmem:[#allocation3] sm:$0x1]  ;;  %v35_v4 = vld [vmem:[#allocation3 + $0x1] sm:$0x1]  ;;  %v39_v6 = vstv %s247_s0 }
  0x13   :  { %v75_v2 = vshrl.u32 %v74_v1, 7  ;;  %v36_v5 = vld [vmem:[#allocation3 + $0x2] sm:$0x1]  ;;  %v43_v7 = vmul.f32 %v34_v3, %v34_v3  ;;  %v44_v8 = vmul.f32 %v35_v4, %v34_v3  ;;  %v46_v10 = vmul.f32 %v35_v4, %v35_v4  ;;  %v41_v11 = vld [vmem:[#allocation3 + $0x4] sm:$0x1] }
  0x14   :  { %v45_v9 = vmul.f32 %v36_v5, %v34_v3  ;;  %v47_v12 = vmul.f32 %v36_v5, %v35_v4  ;;  %v48_v13 = vmul.f32 %v36_v5, %v36_v5  ;;  %v37_v14 = vld [vmem:[#allocation3 + $0x3] sm:$0x1]  ;;  %v173_v15 = vtrunc.f32 %v41_v11 }
  0x15   :  { %v78_v16 = vsub.s32 0, %v75_v2  ;;  %v50_v17 = vrot.slane %v44_v8, 7  ;;  %v56_v19 = vrot.slane %v46_v10, 5  ;;  %vm66_vm3 = vcmask 1041408  }
  0x16   :  { %v53_v18 = vrot.slane %v45_v9, 6  ;;  %v59_v20 = vrot.slane %v47_v12, 4  ;;  %vm68_vm4 = vcmask 1042432   ;;  %v174_v21 = vcvt.f32.s32 %v173_v15 }
  0x17   :  { %v62_v22 = vrot.slane %v48_v13, 3  ;;  %v65_v23 = vsel %vm64_vm2, %v43_v7, %v50_v17  ;;  %vm70_vm5 = vcmask 1043456   ;;  %v40_v24 = vsub.f32 %v37_v14, %v39_v6 }
  0x18   :  { %v67_v25 = vsel %vm66_vm3, %v65_v23, %v53_v18  ;;  %vm72_vm6 = vcmask 1044480   ;;  %v79_v26 = vrot.slane %v174_v21, %v78_v16 }
  0x19   :  { %v69_v27 = vsel %vm68_vm4, %v67_v25, %v56_v19  ;;  %v84_v30 = vrot.slane %v40_v24, %v78_v16  ;;  %v156_v31 = vld [vmem:[%s249_s2] sm:$0xff] }
  0x1a   :  { %v71_v28 = vsel %vm70_vm5, %v69_v27, %v59_v20  ;;  %vm80_vm7 = vcmp.eq.s32.totalorder %v79_v26, %v75_v2 }
  0x1b   :  { %v73_v29 = vsel %vm72_vm6, %v71_v28, %v62_v22 }
  0x1c   :  { %169 = vmatpush3.xpose.msra.mxu0 %v73_v29 }
  0x1f   :  { %171 = vmatmul.mubr.msk.f32.vlgmr.msra.gmra.mrb[0].mxu0 %vm80_vm7, %v84_v30 }
  0xf2   :  { %v152_v32 = vpop.f32.mrb[0].mxu0 }
  0xf3   :  { %v157_v33 = vadd.f32 %v156_v31, %v152_v32  ;;  %v172_v34 = vpop.f32.mrb[1].mxu0 }
  0xf5   :  { %159 = vst.msk [vmem:[%s249_s2] sm:$0xff] %vm32_vm0, %v157_v33 }
  0xf6   :  { %164 = vsyncpa [#allocation4], 1 }

</bundles_post_ra>
